<compile_context>
chip_gen: v5e
topology: v5e:2x2
jax: 0.10.0
libtpu: 0.0.40
codegen_flags: <defaults>
</compile_context>

<pallas_src>
import math

import jax
import jax.numpy as jnp
from jax.experimental import pallas as pl
from jax.experimental.pallas import tpu as pltpu


# ---------------------------------------------------------------------------
# Fused Pallas kernel: encoder MLP + all decoder MLPs + skip + stack
# ---------------------------------------------------------------------------

def _make_autoencoder_kernel(n_encoder_layers, n_decoders, n_decoder_layers,
                             skip_connection):
    """Builds a fused kernel.

    Ref order (all VMEM): x, enc_w0, enc_b0, ..., dec0_w0, dec0_b0, ...,
    dec{D-1}_w{L-1}, dec{D-1}_b{L-1}, out.
    """

    def kernel(*refs):
        x_ref = refs[0]
        out_ref = refs[-1]
        param_refs = refs[1:-1]

        x = x_ref[...]                                   # (bt, embed_dim)

        # --- encoder MLP (ReLU after every Linear, incl. the last) ---------
        idx = 0
        h = x
        for _ in range(n_encoder_layers):
            w = param_refs[idx][...]
            b = param_refs[idx + 1][...]
            idx += 2
            h = jnp.maximum(
                jnp.dot(h, w, preferred_element_type=jnp.float32) + b, 0.0)

        # --- decoder heads --------------------------------------------------
        outs = []
        for _ in range(n_decoders):
            y = h
            for _ in range(n_decoder_layers):
                w = param_refs[idx][...]
                b = param_refs[idx + 1][...]
                idx += 2
                y = jnp.maximum(
                    jnp.dot(y, w, preferred_element_type=jnp.float32) + b, 0.0)
            if skip_connection:
                y = y + x
            outs.append(y)

        # Single dense write of the whole (bt, num_decoders, embed_dim) tile.
        out_ref[...] = jnp.stack(outs, axis=1).astype(out_ref.dtype)

    return kernel


def autoencoder_forward(params, inputs, *, skip_connection=True,
                        batch_tile=None):
    """inputs: (B, embed_dim) -> (B, num_decoders, embed_dim)."""
    encoder = params["encoder"]
    decoders = params["decoders"]
    B, embed_dim = inputs.shape
    num_decoders = len(decoders)
    n_dec_layers = len(decoders[0])

    if batch_tile is None:
        batch_tile = B
    assert B % batch_tile == 0, "B must be divisible by batch_tile"
    grid = (B // batch_tile,)

    # Flatten parameters in the order the kernel consumes them.
    flat_params = []
    param_specs = []
    for (w, b) in encoder + [layer for dec in decoders for layer in dec]:
        flat_params += [w, b]
        # Full weights resident in VMEM for every batch tile.
        param_specs += [pl.BlockSpec(w.shape, lambda i: (0, 0)),
                        pl.BlockSpec(b.shape, lambda i: (0, 0))]

    kernel = _make_autoencoder_kernel(len(encoder), num_decoders,
                                      n_dec_layers, skip_connection)

    return pl.pallas_call(
        kernel,
        out_shape=jax.ShapeDtypeStruct((B, num_decoders, embed_dim),
                                       jnp.float32),
        grid=grid,
        in_specs=[pl.BlockSpec((batch_tile, embed_dim), lambda i: (i, 0))]
                 + param_specs,
        out_specs=pl.BlockSpec((batch_tile, num_decoders, embed_dim),
                               lambda i: (i, 0, 0)),
        compiler_params=pltpu.CompilerParams(
            dimension_semantics=("parallel",)),
    )(inputs, *flat_params)


# ---------------------------------------------------------------------------
# Parameter construction (mimics torch.nn.Linear default init; forward-only,
# weight_decay has no effect on the forward pass)
# ---------------------------------------------------------------------------

def init_linear(key, d_in, d_out):
    kw, kb = jax.random.split(key)
    bound = 1.0 / math.sqrt(d_in)
    w = jax.random.uniform(kw, (d_in, d_out), jnp.float32, -bound, bound)
    b = jax.random.uniform(kb, (1, d_out), jnp.float32, -bound, bound)
    return w, b


def init_mlp(key, d_in, mlp_sizes, d_out):
    # MLPEmbeddingMapper with final_activation='relu': ReLU after every Linear.
    dims = [d_in] + list(mlp_sizes) + [d_out]
    keys = jax.random.split(key, len(dims) - 1)
    return [init_linear(k, dims[i], dims[i + 1]) for i, k in enumerate(keys)]


def init_autoencoder(key, mlp_sizes, embed_dim, num_decoders):
    if len(mlp_sizes) % 2 == 0:
        raise ValueError("mlp_sizes must contain an odd number of elements.")
    n_enc = len(mlp_sizes) // 2
    encoder_mlp_sizes = mlp_sizes[:n_enc]
    latent_dim = mlp_sizes[n_enc]
    decoder_mlp_sizes = mlp_sizes[n_enc + 1:]

    k_enc, k_dec = jax.random.split(key)
    encoder = init_mlp(k_enc, embed_dim, encoder_mlp_sizes, latent_dim)
    dec_keys = jax.random.split(k_dec, num_decoders)
    decoders = [init_mlp(dk, latent_dim, decoder_mlp_sizes, embed_dim)
                for dk in dec_keys]
    return {"encoder": encoder, "decoders": decoders}


# ---------------------------------------------------------------------------
# Pure-JAX reference (for correctness check)
# ---------------------------------------------------------------------------

def reference_forward(params, inputs, *, skip_connection=True):
    def mlp(layers, x):
        for w, b in layers:
            x = jnp.maximum(x @ w + b, 0.0)
        return x

    h = mlp(params["encoder"], inputs)
    outs = []
    for dec in params["decoders"]:
        y = mlp(dec, h)
        if skip_connection:
            y = y + inputs
        outs.append(y[:, None, :])
    return jnp.concatenate(outs, axis=1)


# ---------------------------------------------------------------------------
# Main
# ---------------------------------------------------------------------------

if __name__ == "__main__":
    # Small, module-consistent configuration.
    B = 8                        # multiple of 8 sublanes
    embed_dim = 128              # lane-dense output stores
    mlp_sizes = [64, 32, 64]     # encoder [64], latent 32, decoder [64]
    num_decoders = 2
    skip_connection = True

    key = jax.random.PRNGKey(0)
    k_params, k_in = jax.random.split(key)

    params = init_autoencoder(k_params, mlp_sizes, embed_dim, num_decoders)
    inputs = jax.random.normal(k_in, (B, embed_dim), dtype=jnp.float32)

    fwd = jax.jit(lambda x: autoencoder_forward(
        params, x, skip_connection=skip_connection))
    result = fwd(inputs)
    jax.block_until_ready(result)

    ref = reference_forward(params, inputs, skip_connection=skip_connection)

    assert result.shape == (B, num_decoders, embed_dim)
    assert jnp.allclose(result, ref, atol=1e-4, rtol=1e-4), (
        "Pallas kernel diverges from pure-JAX reference")
    print("KERNEL_OK")
</pallas_src>

<mosaic_0001>
module attributes {stable_mosaic.version = 11 : i64} {
  func.func @kernel(%arg0: i32, %arg1: memref<8x128xf32, #tpu.memory_space<vmem>>, %arg2: memref<128x64xf32, #tpu.memory_space<vmem>>, %arg3: memref<1x64xf32, #tpu.memory_space<vmem>>, %arg4: memref<64x32xf32, #tpu.memory_space<vmem>>, %arg5: memref<1x32xf32, #tpu.memory_space<vmem>>, %arg6: memref<32x64xf32, #tpu.memory_space<vmem>>, %arg7: memref<1x64xf32, #tpu.memory_space<vmem>>, %arg8: memref<64x128xf32, #tpu.memory_space<vmem>>, %arg9: memref<1x128xf32, #tpu.memory_space<vmem>>, %arg10: memref<32x64xf32, #tpu.memory_space<vmem>>, %arg11: memref<1x64xf32, #tpu.memory_space<vmem>>, %arg12: memref<64x128xf32, #tpu.memory_space<vmem>>, %arg13: memref<1x128xf32, #tpu.memory_space<vmem>>, %arg14: memref<8x2x128xf32, #tpu.memory_space<vmem>>) attributes {dimension_semantics = [#tpu.dimension_semantics<parallel>], iteration_bounds = array<i64: 1>, scalar_prefetch = 0 : i64, scratch_operands = 0 : i64, tpu.core_type = #tpu.core_type<tc>, window_params = [{transform_indices = @transform_0, window_bounds = array<i64: 8, 128>}, {pipeline_mode = #tpu.pipeline_mode<synchronous>, transform_indices = @transform_1, window_bounds = array<i64: 128, 64>}, {pipeline_mode = #tpu.pipeline_mode<synchronous>, transform_indices = @transform_2, window_bounds = array<i64: 1, 64>}, {pipeline_mode = #tpu.pipeline_mode<synchronous>, transform_indices = @transform_3, window_bounds = array<i64: 64, 32>}, {pipeline_mode = #tpu.pipeline_mode<synchronous>, transform_indices = @transform_4, window_bounds = array<i64: 1, 32>}, {pipeline_mode = #tpu.pipeline_mode<synchronous>, transform_indices = @transform_5, window_bounds = array<i64: 32, 64>}, {pipeline_mode = #tpu.pipeline_mode<synchronous>, transform_indices = @transform_6, window_bounds = array<i64: 1, 64>}, {pipeline_mode = #tpu.pipeline_mode<synchronous>, transform_indices = @transform_7, window_bounds = array<i64: 64, 128>}, {pipeline_mode = #tpu.pipeline_mode<synchronous>, transform_indices = @transform_8, window_bounds = array<i64: 1, 128>}, {pipeline_mode = #tpu.pipeline_mode<synchronous>, transform_indices = @transform_9, window_bounds = array<i64: 32, 64>}, {pipeline_mode = #tpu.pipeline_mode<synchronous>, transform_indices = @transform_10, window_bounds = array<i64: 1, 64>}, {pipeline_mode = #tpu.pipeline_mode<synchronous>, transform_indices = @transform_11, window_bounds = array<i64: 64, 128>}, {pipeline_mode = #tpu.pipeline_mode<synchronous>, transform_indices = @transform_12, window_bounds = array<i64: 1, 128>}, {transform_indices = @transform_13, window_bounds = array<i64: 8, 2, 128>}]} {
    %c0 = arith.constant 0 : index
    %c0_0 = arith.constant 0 : index
    %0 = vector.load %arg1[%c0, %c0_0] : memref<8x128xf32, #tpu.memory_space<vmem>>, vector<8x128xf32>
    %c0_1 = arith.constant 0 : index
    %c0_2 = arith.constant 0 : index
    %1 = vector.load %arg2[%c0_1, %c0_2] : memref<128x64xf32, #tpu.memory_space<vmem>>, vector<128x64xf32>
    %c0_3 = arith.constant 0 : index
    %c0_4 = arith.constant 0 : index
    %2 = vector.load %arg3[%c0_3, %c0_4] : memref<1x64xf32, #tpu.memory_space<vmem>>, vector<1x64xf32>
    %cst = arith.constant dense<0.000000e+00> : vector<8x64xf32>
    %3 = tpu.matmul %0, %1, %cst {dimension_numbers = #tpu.dot_dimension_numbers<[1], [0], [0], [1], [0, 0, 1, 1], [], []>} : vector<8x128xf32>, vector<128x64xf32>, vector<8x64xf32> -> vector<8x64xf32>
    %4 = vector.broadcast %2 : vector<1x64xf32> to vector<8x64xf32>
    %5 = arith.addf %3, %4 : vector<8x64xf32>
    %cst_5 = arith.constant 0.000000e+00 : f32
    %6 = vector.broadcast %cst_5 : f32 to vector<8x64xf32>
    %7 = arith.maximumf %5, %6 : vector<8x64xf32>
    %c0_6 = arith.constant 0 : index
    %c0_7 = arith.constant 0 : index
    %8 = vector.load %arg4[%c0_6, %c0_7] : memref<64x32xf32, #tpu.memory_space<vmem>>, vector<64x32xf32>
    %c0_8 = arith.constant 0 : index
    %c0_9 = arith.constant 0 : index
    %9 = vector.load %arg5[%c0_8, %c0_9] : memref<1x32xf32, #tpu.memory_space<vmem>>, vector<1x32xf32>
    %cst_10 = arith.constant dense<0.000000e+00> : vector<8x32xf32>
    %10 = tpu.matmul %7, %8, %cst_10 {dimension_numbers = #tpu.dot_dimension_numbers<[1], [0], [0], [1], [0, 0, 1, 1], [], []>} : vector<8x64xf32>, vector<64x32xf32>, vector<8x32xf32> -> vector<8x32xf32>
    %11 = vector.broadcast %9 : vector<1x32xf32> to vector<8x32xf32>
    %12 = arith.addf %10, %11 : vector<8x32xf32>
    %cst_11 = arith.constant 0.000000e+00 : f32
    %13 = vector.broadcast %cst_11 : f32 to vector<8x32xf32>
    %14 = arith.maximumf %12, %13 : vector<8x32xf32>
    %c0_12 = arith.constant 0 : index
    %c0_13 = arith.constant 0 : index
    %15 = vector.load %arg6[%c0_12, %c0_13] : memref<32x64xf32, #tpu.memory_space<vmem>>, vector<32x64xf32>
    %c0_14 = arith.constant 0 : index
    %c0_15 = arith.constant 0 : index
    %16 = vector.load %arg7[%c0_14, %c0_15] : memref<1x64xf32, #tpu.memory_space<vmem>>, vector<1x64xf32>
    %cst_16 = arith.constant dense<0.000000e+00> : vector<8x64xf32>
    %17 = tpu.matmul %14, %15, %cst_16 {dimension_numbers = #tpu.dot_dimension_numbers<[1], [0], [0], [1], [0, 0, 1, 1], [], []>} : vector<8x32xf32>, vector<32x64xf32>, vector<8x64xf32> -> vector<8x64xf32>
    %18 = vector.broadcast %16 : vector<1x64xf32> to vector<8x64xf32>
    %19 = arith.addf %17, %18 : vector<8x64xf32>
    %cst_17 = arith.constant 0.000000e+00 : f32
    %20 = vector.broadcast %cst_17 : f32 to vector<8x64xf32>
    %21 = arith.maximumf %19, %20 : vector<8x64xf32>
    %c0_18 = arith.constant 0 : index
    %c0_19 = arith.constant 0 : index
    %22 = vector.load %arg8[%c0_18, %c0_19] : memref<64x128xf32, #tpu.memory_space<vmem>>, vector<64x128xf32>
    %c0_20 = arith.constant 0 : index
    %c0_21 = arith.constant 0 : index
    %23 = vector.load %arg9[%c0_20, %c0_21] : memref<1x128xf32, #tpu.memory_space<vmem>>, vector<1x128xf32>
    %cst_22 = arith.constant dense<0.000000e+00> : vector<8x128xf32>
    %24 = tpu.matmul %21, %22, %cst_22 {dimension_numbers = #tpu.dot_dimension_numbers<[1], [0], [0], [1], [0, 0, 1, 1], [], []>} : vector<8x64xf32>, vector<64x128xf32>, vector<8x128xf32> -> vector<8x128xf32>
    %25 = vector.broadcast %23 : vector<1x128xf32> to vector<8x128xf32>
    %26 = arith.addf %24, %25 : vector<8x128xf32>
    %cst_23 = arith.constant 0.000000e+00 : f32
    %27 = vector.broadcast %cst_23 : f32 to vector<8x128xf32>
    %28 = arith.maximumf %26, %27 : vector<8x128xf32>
    %29 = arith.addf %28, %0 : vector<8x128xf32>
    %c0_24 = arith.constant 0 : index
    %c0_25 = arith.constant 0 : index
    %30 = vector.load %arg10[%c0_24, %c0_25] : memref<32x64xf32, #tpu.memory_space<vmem>>, vector<32x64xf32>
    %c0_26 = arith.constant 0 : index
    %c0_27 = arith.constant 0 : index
    %31 = vector.load %arg11[%c0_26, %c0_27] : memref<1x64xf32, #tpu.memory_space<vmem>>, vector<1x64xf32>
    %cst_28 = arith.constant dense<0.000000e+00> : vector<8x64xf32>
    %32 = tpu.matmul %14, %30, %cst_28 {dimension_numbers = #tpu.dot_dimension_numbers<[1], [0], [0], [1], [0, 0, 1, 1], [], []>} : vector<8x32xf32>, vector<32x64xf32>, vector<8x64xf32> -> vector<8x64xf32>
    %33 = vector.broadcast %31 : vector<1x64xf32> to vector<8x64xf32>
    %34 = arith.addf %32, %33 : vector<8x64xf32>
    %cst_29 = arith.constant 0.000000e+00 : f32
    %35 = vector.broadcast %cst_29 : f32 to vector<8x64xf32>
    %36 = arith.maximumf %34, %35 : vector<8x64xf32>
    %c0_30 = arith.constant 0 : index
    %c0_31 = arith.constant 0 : index
    %37 = vector.load %arg12[%c0_30, %c0_31] : memref<64x128xf32, #tpu.memory_space<vmem>>, vector<64x128xf32>
    %c0_32 = arith.constant 0 : index
    %c0_33 = arith.constant 0 : index
    %38 = vector.load %arg13[%c0_32, %c0_33] : memref<1x128xf32, #tpu.memory_space<vmem>>, vector<1x128xf32>
    %cst_34 = arith.constant dense<0.000000e+00> : vector<8x128xf32>
    %39 = tpu.matmul %36, %37, %cst_34 {dimension_numbers = #tpu.dot_dimension_numbers<[1], [0], [0], [1], [0, 0, 1, 1], [], []>} : vector<8x64xf32>, vector<64x128xf32>, vector<8x128xf32> -> vector<8x128xf32>
    %40 = vector.broadcast %38 : vector<1x128xf32> to vector<8x128xf32>
    %41 = arith.addf %39, %40 : vector<8x128xf32>
    %cst_35 = arith.constant 0.000000e+00 : f32
    %42 = vector.broadcast %cst_35 : f32 to vector<8x128xf32>
    %43 = arith.maximumf %41, %42 : vector<8x128xf32>
    %44 = arith.addf %43, %0 : vector<8x128xf32>
    %45 = vector.shape_cast %29 : vector<8x128xf32> to vector<8x1x128xf32>
    %46 = vector.shape_cast %44 : vector<8x128xf32> to vector<8x1x128xf32>
    %47 = tpu.concatenate %45, %46 in 1 : vector<8x1x128xf32>, vector<8x1x128xf32> -> vector<8x2x128xf32>
    %c0_36 = arith.constant 0 : index
    %c0_37 = arith.constant 0 : index
    %c0_38 = arith.constant 0 : index
    %48 = vector.load %arg14[%c0_36, %c0_37, %c0_38] : memref<8x2x128xf32, #tpu.memory_space<vmem>>, vector<8x2x128xf32>
    tpu.vector_store %arg14[%c0_36, %c0_37, %c0_38], %47 {strides = array<i32>} : memref<8x2x128xf32, #tpu.memory_space<vmem>>, vector<8x2x128xf32>,
    return
  }
  func.func @transform_0(%arg0: i32) -> (i32, i32) {
    %c0_i32 = arith.constant 0 : i32
    %c0_i32_0 = arith.constant 0 : i32
    return %arg0, %c0_i32 : i32, i32
  }
  func.func @transform_1(%arg0: i32) -> (i32, i32) {
    %c0_i32 = arith.constant 0 : i32
    %c0_i32_0 = arith.constant 0 : i32
    %c0_i32_1 = arith.constant 0 : i32
    return %c0_i32, %c0_i32_0 : i32, i32
  }
  func.func @transform_2(%arg0: i32) -> (i32, i32) {
    %c0_i32 = arith.constant 0 : i32
    %c0_i32_0 = arith.constant 0 : i32
    %c0_i32_1 = arith.constant 0 : i32
    return %c0_i32, %c0_i32_0 : i32, i32
  }
  func.func @transform_3(%arg0: i32) -> (i32, i32) {
    %c0_i32 = arith.constant 0 : i32
    %c0_i32_0 = arith.constant 0 : i32
    %c0_i32_1 = arith.constant 0 : i32
    return %c0_i32, %c0_i32_0 : i32, i32
  }
  func.func @transform_4(%arg0: i32) -> (i32, i32) {
    %c0_i32 = arith.constant 0 : i32
    %c0_i32_0 = arith.constant 0 : i32
    %c0_i32_1 = arith.constant 0 : i32
    return %c0_i32, %c0_i32_0 : i32, i32
  }
  func.func @transform_5(%arg0: i32) -> (i32, i32) {
    %c0_i32 = arith.constant 0 : i32
    %c0_i32_0 = arith.constant 0 : i32
    %c0_i32_1 = arith.constant 0 : i32
    return %c0_i32, %c0_i32_0 : i32, i32
  }
  func.func @transform_6(%arg0: i32) -> (i32, i32) {
    %c0_i32 = arith.constant 0 : i32
    %c0_i32_0 = arith.constant 0 : i32
    %c0_i32_1 = arith.constant 0 : i32
    return %c0_i32, %c0_i32_0 : i32, i32
  }
  func.func @transform_7(%arg0: i32) -> (i32, i32) {
    %c0_i32 = arith.constant 0 : i32
    %c0_i32_0 = arith.constant 0 : i32
    %c0_i32_1 = arith.constant 0 : i32
    return %c0_i32, %c0_i32_0 : i32, i32
  }
  func.func @transform_8(%arg0: i32) -> (i32, i32) {
    %c0_i32 = arith.constant 0 : i32
    %c0_i32_0 = arith.constant 0 : i32
    %c0_i32_1 = arith.constant 0 : i32
    return %c0_i32, %c0_i32_0 : i32, i32
  }
  func.func @transform_9(%arg0: i32) -> (i32, i32) {
    %c0_i32 = arith.constant 0 : i32
    %c0_i32_0 = arith.constant 0 : i32
    %c0_i32_1 = arith.constant 0 : i32
    return %c0_i32, %c0_i32_0 : i32, i32
  }
  func.func @transform_10(%arg0: i32) -> (i32, i32) {
    %c0_i32 = arith.constant 0 : i32
    %c0_i32_0 = arith.constant 0 : i32
    %c0_i32_1 = arith.constant 0 : i32
    return %c0_i32, %c0_i32_0 : i32, i32
  }
  func.func @transform_11(%arg0: i32) -> (i32, i32) {
    %c0_i32 = arith.constant 0 : i32
    %c0_i32_0 = arith.constant 0 : i32
    %c0_i32_1 = arith.constant 0 : i32
    return %c0_i32, %c0_i32_0 : i32, i32
  }
  func.func @transform_12(%arg0: i32) -> (i32, i32) {
    %c0_i32 = arith.constant 0 : i32
    %c0_i32_0 = arith.constant 0 : i32
    %c0_i32_1 = arith.constant 0 : i32
    return %c0_i32, %c0_i32_0 : i32, i32
  }
  func.func @transform_13(%arg0: i32) -> (i32, i32, i32) {
    %c0_i32 = arith.constant 0 : i32
    %c0_i32_0 = arith.constant 0 : i32
    %c0_i32_1 = arith.constant 0 : i32
    return %arg0, %c0_i32, %c0_i32_0 : i32, i32, i32
  }
}

</mosaic_0001>

<bundles_post_ra>
// kernel: _lambda_.1
= control target key start
LH: loop header
LB: loop body
LE: loop exit
PB: predicated region body
PF: predicated region fallthrough
CT: control target
= control target key end

     0   :  { %18 = vsyncpa [#allocation3], 0  ;;  %s910_s0 = inlined_call_operand.hbm [shape: f32[8,128], index: 0, kind: input, shape index: {}]   ;;  %s911_s1 = inlined_call_operand.hbm [shape: f32[128,64], index: 1, kind: input, shape index: {}]   ;;  %s912_s2 = inlined_call_operand.hbm [shape: f32[1,64], index: 2, kind: input, shape index: {}]   ;;  %s913_s3 = inlined_call_operand.hbm [shape: f32[64,32], index: 3, kind: input, shape index: {}]   ;;  %s914_s4 = inlined_call_operand.hbm [shape: f32[1,32], index: 4, kind: input, shape index: {}]   ;;  %s915_s5 = inlined_call_operand.hbm [shape: f32[32,64], index: 5, kind: input, shape index: {}]   ;;  %s916_s6 = inlined_call_operand.vmem [shape: f32[1,64], index: 6, kind: input, shape index: {}]   ;;  %s917_s7 = inlined_call_operand.hbm [shape: f32[64,128], index: 7, kind: input, shape index: {}]   ;;  %s918_s8 = inlined_call_operand.vmem [shape: f32[1,128], index: 8, kind: input, shape index: {}]   ;;  %s919_s9 = inlined_call_operand.hbm [shape: f32[32,64], index: 9, kind: input, shape index: {}]   ;;  %s920_s10 = inlined_call_operand.vmem [shape: f32[1,64], index: 10, kind: input, shape index: {}]   ;;  %s921_s11 = inlined_call_operand.hbm [shape: f32[64,128], index: 11, kind: input, shape index: {}]   ;;  %s922_s12 = inlined_call_operand.vmem [shape: f32[1,128], index: 12, kind: input, shape index: {}]   ;;  %s923_s13 = inlined_call_operand.hbm [shape: f32[8,2,128], index: 13, kind: output, shape index: {}]  }
   0x1   :  { %19 = vsyncpa [#allocation6], 0 }
   0x2   :  { %20 = vsyncpa [#allocation9], 0 }
   0x3   :  { %21 = vsyncpa [#allocation12], 0 }
   0x4   :  { %22 = vsyncpa [#allocation15], 0  ;;  %s39_s27 = sshll.u32 %s911_s1, 4  ;;  %s40_s27 = int_to_ptr.hbm [resolvable:$true] %s39_s27 }
   0x5   :  { %23 = vsyncpa [#allocation4], 0  ;;  %s750_s28 = smov [#allocation5]   ;;  %s63_s15 = sshll.u32 %s913_s3, 4  ;;  %s64_s15 = int_to_ptr.hbm [resolvable:$true] %s63_s15 }
   0x6   :  { %s41_s29 = sshll.u32 %s750_s28, 4  ;;  %s751_s16 = smov 128   ;;  %s42_s29 = int_to_ptr.vmem [resolvable:$true] %s41_s29 }
   0x7   :  { %s752_s17 = smov 8   ;;  %s753_s18 = smov [#allocation8]  }
   0x8   :  { %47 = dma.hbm_to_vmem [thread:$0]  %s40_s27, 2048, %s42_s29, [#allocation6], %s751_s16, %s751_s16, %s752_s17  }
   0x9   :  { %s65_s19 = sshll.u32 %s753_s18, 4  ;;  %s87_s21 = sshll.u32 %s915_s5, 4  ;;  %s66_s19 = int_to_ptr.vmem [resolvable:$true] %s65_s19  ;;  %s88_s21 = int_to_ptr.hbm [resolvable:$true] %s87_s21 }
   0xa   :  { %71 = dma.hbm_to_vmem [thread:$0]  %s64_s15, 1024, %s66_s19, [#allocation9], %s751_s16, %s751_s16, %s752_s17  }
   0xb   :  { %s117_s23 = sshll.u32 %s919_s9, 4  ;;  %s754_s24 = smov [#allocation11]   ;;  %s118_s23 = int_to_ptr.hbm [resolvable:$true] %s117_s23 }
   0xc   :  { %s89_s25 = sshll.u32 %s754_s24, 4  ;;  %s755_s26 = smov [#allocation14]   ;;  %s90_s25 = int_to_ptr.vmem [resolvable:$true] %s89_s25 }
   0xd   :  { %95 = dma.hbm_to_vmem [thread:$0]  %s88_s21, 512, %s90_s25, [#allocation12], %s751_s16, %s751_s16, %s752_s17  }
   0xe   :  { %s119_s5 = sshll.u32 %s755_s26, 4  ;;  %s29_s29 = sshll.u32 %s910_s0, 4  ;;  %s120_s5 = int_to_ptr.vmem [resolvable:$true] %s119_s5  ;;  %s30_s29 = int_to_ptr.hbm [resolvable:$true] %s29_s29 }
   0xf   :  { %125 = dma.hbm_to_vmem [thread:$0]  %s118_s23, 512, %s120_s5, [#allocation15], %s751_s16, %s751_s16, %s752_s17  }
  0x10   :  { %s53_s14 = sshll.u32 %s912_s2, 4  ;;  %s756_s15 = smov [#allocation2]   ;;  %s54_s14 = int_to_ptr.hbm [resolvable:$true] %s53_s14 }
  0x11   :  { %s31_s18 = sshll.u32 %s756_s15, 4  ;;  %s757_s19 = smov [#allocation7]   ;;  %s32_s18 = int_to_ptr.vmem [resolvable:$true] %s31_s18 }
  0x12   :  { %34 = dma.hbm_to_vmem [thread:$0]  %s30_s29, 128, %s32_s18, [#allocation3]  }
  0x13   :  { %s55_s20 = sshll.u32 %s757_s19, 4  ;;  %s77_s0 = sshll.u32 %s914_s4, 4  ;;  %s56_s20 = int_to_ptr.vmem [resolvable:$true] %s55_s20  ;;  %s78_s0 = int_to_ptr.hbm [resolvable:$true] %s77_s0 }
  0x14   :  { %58 = dma.hbm_to_vmem [thread:$0]  %s54_s14, 16, %s56_s20, [#allocation6]  }
  0x15   :  { %s102_s23 = sshll.u32 %s917_s7, 4  ;;  %s758_s24 = smov [#allocation10]   ;;  %s103_s23 = int_to_ptr.hbm [resolvable:$true] %s102_s23 }
  0x16   :  { %s79_s2 = sshll.u32 %s758_s24, 4  ;;  %s759_s25 = smov [#allocation13]   ;;  %s80_s2 = int_to_ptr.vmem [resolvable:$true] %s79_s2 }
  0x17   :  { %82 = dma.hbm_to_vmem [thread:$0]  %s78_s0, 16, %s80_s2, [#allocation9]  }
  0x18   :  { %s104_s26 = sshll.u32 %s759_s25, 4  ;;  %s132_s28 = sshll.u32 %s921_s11, 4  ;;  %s105_s26 = int_to_ptr.vmem [resolvable:$true] %s104_s26  ;;  %s133_s28 = int_to_ptr.hbm [resolvable:$true] %s132_s28 }
  0x19   :  { %110 = dma.hbm_to_vmem [thread:$0]  %s103_s23, 1024, %s105_s26, [#allocation12], %s751_s16, %s751_s16, %s752_s17  }
  0x1a   :  { %s760_s4 = smov [#allocation16]  }
  0x1b   :  { %s134_s29 = sshll.u32 %s760_s4, 4  ;;  %s135_s29 = int_to_ptr.vmem [resolvable:$true] %s134_s29 }
  0x1c   :  { %140 = dma.hbm_to_vmem [thread:$0]  %s133_s28, 1024, %s135_s29, [#allocation15], %s751_s16, %s751_s16, %s752_s17  }
  0x1d   :  { %738 = dma.done.wait [#allocation3], 128  }
  0x1e   :  { %739 = vsyncadd [#allocation3], 4294967168 }
  0x1f   :  { %740 = dma.done.wait [#allocation6], 2064  }
  0x20   :  { %741 = vsyncadd [#allocation6], 4294965232 }
  0x21   :  { %742 = dma.done.wait [#allocation9], 1040  }
  0x22   :  { %743 = vsyncadd [#allocation9], 4294966256 }
  0x23   :  { %744 = dma.done.wait [#allocation12], 1536  }
  0x24   :  { %745 = vsyncadd [#allocation12], 4294965760 }
  0x25   :  { %746 = dma.done.wait [#allocation15], 1536  }
  0x26   :  { %747 = vsyncadd [#allocation15], 4294965760  ;;  %v195_v0 = vld [vmem:[#allocation5 + $0x78] sm:$0xff]  ;;  %v194_v1 = vld [vmem:[#allocation5 + $0x70] sm:$0xff]  ;;  %vm233_vm0 = vcmask 523264   ;;  %vm266_vm1 = vcmask 261120  }
  0x27   :  { %200 = vmatpush.msra.mxu0 %v195_v0  ;;  %v193_v2 = vld [vmem:[#allocation5 + $0x68] sm:$0xff]  ;;  %v192_v3 = vld [vmem:[#allocation5 + $0x60] sm:$0xff]  ;;  %v191_v5 = vld [vmem:[#allocation5 + $0x58] sm:$0xff]  ;;  %vm433_vm2 = vcmask 1040384   ;;  %s456_s18 = sshll.u32 %s923_s13, 4  ;;  %s762_s19 = smov 32   ;;  %s457_s18 = int_to_ptr.hbm [resolvable:$true] %s456_s18 }
  0x28   :  { %v228_v4 = vld [vmem:[#allocation8 + $0x38] sm:$0xff]  ;;  %v227_v6 = vld [vmem:[#allocation8 + $0x30] sm:$0xff]  ;;  %v226_v8 = vld [vmem:[#allocation8 + $0x28] sm:$0xff]  ;;  %s763_s20 = smov 2  }
  0x29   :  { %201 = vmatpush.msra.mxu0 %v194_v1  ;;  %245 = vmatpush.msra.mxu1 %v228_v4  ;;  %v190_v7 = vld [vmem:[#allocation5 + $0x50] sm:$0xff]  ;;  %v225_v9 = vld [vmem:[#allocation8 + $0x20] sm:$0xff]  ;;  %v224_v11 = vld [vmem:[#allocation8 + $0x18] sm:$0xff] }
  0x2a   :  { %v189_v10 = vld [vmem:[#allocation5 + $0x48] sm:$0xff]  ;;  %v188_v12 = vld [vmem:[#allocation5 + $0x40] sm:$0xff]  ;;  %v187_v13 = vld [vmem:[#allocation5 + $0x38] sm:$0xff] }
  0x2b   :  { %202 = vmatpush.msra.mxu0 %v193_v2  ;;  %246 = vmatpush.msra.mxu1 %v227_v6  ;;  %v186_v14 = vld [vmem:[#allocation5 + $0x30] sm:$0xff]  ;;  %v185_v15 = vld [vmem:[#allocation5 + $0x28] sm:$0xff]  ;;  %v184_v16 = vld [vmem:[#allocation5 + $0x20] sm:$0xff] }
  0x2c   :  { %v183_v17 = vld [vmem:[#allocation5 + $0x18] sm:$0xff]  ;;  %v182_v18 = vld [vmem:[#allocation5 + $0x10] sm:$0xff]  ;;  %v181_v19 = vld [vmem:[#allocation5 + $0x8] sm:$0xff] }
  0x2d   :  { %203 = vmatpush.msra.mxu0 %v192_v3  ;;  %247 = vmatpush.msra.mxu1 %v226_v8  ;;  %v180_v20 = vld [vmem:[#allocation5] sm:$0xff]  ;;  %v879_v21 = vld [vmem:[#allocation2] sm:$0xff]  ;;  %v222_v23 = vld [vmem:[#allocation8 + $0x8] sm:$0xff] }
  0x2e   :  { %v223_v22 = vld [vmem:[#allocation8 + $0x10] sm:$0xff]  ;;  %v221_v24 = vld [vmem:[#allocation8] sm:$0xff]  ;;  %v492_v26 = vld [vmem:[#allocation7] ss:$0 sm:$0xff] }
  0x2f   :  { %204 = vmatpush.msra.mxu0 %v191_v5  ;;  %248 = vmatpush.msra.mxu1 %v225_v9  ;;  %v261_v25 = vld [vmem:[#allocation11 + $0x18] sm:$0xff]  ;;  %v260_v30 = vld [vmem:[#allocation11 + $0x10] sm:$0xff]  ;;  %v259_v31 = vld [vmem:[#allocation11 + $0x8] sm:$0xff] }
  0x30   :  { %282 = vmatpush.msra.mxu2 %v261_v25  ;;  %v258_v32 = vld [vmem:[#allocation11] sm:$0xff]  ;;  %v331_v33 = vld [vmem:[#allocation14 + $0x18] sm:$0xff]  ;;  %v330_v34 = vld [vmem:[#allocation14 + $0x10] sm:$0xff] }
  0x31   :  { %205 = vmatpush.msra.mxu0 %v190_v7  ;;  %249 = vmatpush.msra.mxu1 %v224_v11  ;;  %v329_v35 = vld [vmem:[#allocation14 + $0x8] sm:$0xff]  ;;  %v328_v36 = vld [vmem:[#allocation14] sm:$0xff]  ;;  %v298_v37 = vld [vmem:[#allocation13 + $0x38] sm:$0xff] }
  0x32   :  { %283 = vmatpush.msra.mxu2 %v260_v30  ;;  %v297_v38 = vld [vmem:[#allocation13 + $0x30] sm:$0xff]  ;;  %314 = vmatpush.msra.mxu3 %v298_v37  ;;  %v364_v39 = vld [vmem:[#allocation16 + $0x38] sm:$0xff]  ;;  %v296_v40 = vld [vmem:[#allocation13 + $0x28] sm:$0xff] }
  0x33   :  { %206 = vmatpush.msra.mxu0 %v189_v10  ;;  %250 = vmatpush.msra.mxu1 %v223_v22  ;;  %v295_v41 = vld [vmem:[#allocation13 + $0x20] sm:$0xff]  ;;  %v294_v42 = vld [vmem:[#allocation13 + $0x18] sm:$0xff]  ;;  %v293_v47 = vld [vmem:[#allocation13 + $0x10] sm:$0xff] }
  0x34   :  { %284 = vmatpush.msra.mxu2 %v259_v31  ;;  %315 = vmatpush.msra.mxu3 %v297_v38  ;;  %v493_v43 = vld [vmem:[#allocation10] ss:$0 sm:$0xff]  ;;  %v363_v48 = vld [vmem:[#allocation16 + $0x30] sm:$0xff]  ;;  %v292_v49 = vld [vmem:[#allocation13 + $0x8] sm:$0xff] }
  0x35   :  { %207 = vmatpush.msra.mxu0 %v188_v12  ;;  %251 = vmatpush.msra.mxu1 %v222_v23  ;;  %v362_v50 = vld [vmem:[#allocation16 + $0x28] sm:$0xff]  ;;  %v291_v51 = vld [vmem:[#allocation13] sm:$0xff]  ;;  %v360_v53 = vld [vmem:[#allocation16 + $0x18] sm:$0xff] }
  0x36   :  { %285 = vmatpush.msra.mxu2 %v258_v32  ;;  %316 = vmatpush.msra.mxu3 %v296_v40  ;;  %v361_v52 = vld [vmem:[#allocation16 + $0x20] sm:$0xff]  ;;  %v359_v54 = vld [vmem:[#allocation16 + $0x10] sm:$0xff]  ;;  %v358_v55 = vld [vmem:[#allocation16 + $0x8] sm:$0xff] }
  0x37   :  { %208 = vmatpush.msra.mxu0 %v187_v13  ;;  %252 = vmatpush.msra.mxu1 %v221_v24  ;;  %v357_v56 = vld [vmem:[#allocation16] sm:$0xff]  ;;  %v494_v57 = vld [vmem:[%s916_s6] ss:$0 sm:$0xff] }
  0x38   :  { %348 = vmatpush.msrb.mxu2 %v331_v33  ;;  %317 = vmatpush.msra.mxu3 %v295_v41  ;;  %v495_v61 = vld [vmem:[%s920_s10] ss:$0 sm:$0xff] }
  0x39   :  { %209 = vmatpush.msra.mxu0 %v186_v14  ;;  %380 = vmatpush.msrb.mxu1 %v364_v39  ;;  %v496_v1 = vld [vmem:[%s918_s8] ss:$0 sm:$0xff]  ;;  %s761_s8 = smov [#allocation17]  }
  0x3a   :  { %349 = vmatpush.msrb.mxu2 %v330_v34  ;;  %318 = vmatpush.msra.mxu3 %v294_v42  ;;  %v497_v2 = vld [vmem:[%s922_s12] ss:$0 sm:$0xff]  ;;  %s454_s10 = sshll.u32 %s761_s8, 4  ;;  %s455_s10 = int_to_ptr.vmem [resolvable:$true] %s454_s10 }
  0x3b   :  { %210 = vmatpush.msra.mxu0 %v185_v15  ;;  %381 = vmatpush.msrb.mxu1 %v363_v48 }
  0x3c   :  { %350 = vmatpush.msrb.mxu2 %v329_v35  ;;  %319 = vmatpush.msra.mxu3 %v293_v47 }
  0x3d   :  { %211 = vmatpush.msra.mxu0 %v184_v16  ;;  %382 = vmatpush.msrb.mxu1 %v362_v50 }
  0x3e   :  { %351 = vmatpush.msrb.mxu2 %v328_v36  ;;  %320 = vmatpush.msra.mxu3 %v292_v49 }
  0x3f   :  { %212 = vmatpush.msra.mxu0 %v183_v17  ;;  %383 = vmatpush.msrb.mxu1 %v361_v52 }
  0x40   :  { %321 = vmatpush.msra.mxu3 %v291_v51 }
  0x41   :  { %213 = vmatpush.msra.mxu0 %v182_v18  ;;  %384 = vmatpush.msrb.mxu1 %v360_v53 }
  0x43   :  { %214 = vmatpush.msra.mxu0 %v181_v19  ;;  %385 = vmatpush.msrb.mxu1 %v359_v54 }
  0x45   :  { %215 = vmatpush.msra.mxu0 %v180_v20  ;;  %386 = vmatpush.msrb.mxu1 %v358_v55 }
  0x46   :  { %216 = vmatmul.f32.vlgmr.msra.gmra.mxu0 %v879_v21 }
  0x47   :  { %387 = vmatpush.msrb.mxu1 %v357_v56 }
  0xc3   :  { %v217_v27 = vpop.f32.mrf.mxu0 }
  0xc4   :  { %v218_v28 = vadd.f32 %v492_v26, %v217_v27 }
  0xc6   :  { %v220_v29 = vmax.f32 %v218_v28, 0.0 }
  0xc8   :  { %473 = vmatmul.msk.f32.vlgmr.msra.gmra.mxu1 %vm233_vm0, %v220_v29 }
 0x145   :  { %v254_v44 = vpop.f32.mrf.mxu1 }
 0x146   :  { %v255_v45 = vadd.f32 %v493_v43, %v254_v44 }
 0x148   :  { %v257_v46 = vmax.f32 %v255_v45, 0.0 }
 0x14a   :  { %474 = vmatmul.msk.f32.vlgmr.msra.gmra.mxu2 %vm266_vm1, %v257_v46 }
 0x152   :  { %476 = vmatmul.msk.f32.vlgmr.msrb.gmra.mxu2 %vm266_vm1, %v257_v46 }
 0x1cd   :  { %v287_v58 = vpop.f32.mrf.mxu2 }
 0x1ce   :  { %v288_v59 = vadd.f32 %v494_v57, %v287_v58 }
 0x1d0   :  { %v290_v60 = vmax.f32 %v288_v59, 0.0 }
 0x1d2   :  { %475 = vmatmul.msk.f32.vlgmr.msra.gmra.mxu3 %vm233_vm0, %v290_v60 }
 0x1d5   :  { %v353_v62 = vpop.f32.mrf.mxu2 }
 0x1d6   :  { %v354_v63 = vadd.f32 %v495_v61, %v353_v62 }
 0x1d8   :  { %v356_v0 = vmax.f32 %v354_v63, 0.0 }
 0x1da   :  { %477 = vmatmul.msk.f32.vlgmr.msrb.gmra.mxu1 %vm233_vm0, %v356_v0 }
 0x255   :  { %v323_v3 = vpop.f32.mrf.mxu3 }
 0x256   :  { %v324_v4 = vadd.f32 %v496_v1, %v323_v3 }
 0x257   :  { %v389_v5 = vpop.f32.mrf.mxu1 }
 0x258   :  { %v326_v6 = vmax.f32 %v324_v4, 0.0  ;;  %v390_v7 = vadd.f32 %v497_v2, %v389_v5 }
 0x25a   :  { %v327_v8 = vadd.f32 %v326_v6, %v879_v21  ;;  %v392_v9 = vmax.f32 %v390_v7, 0.0 }
 0x25c   :  { %v393_v10 = vadd.f32 %v392_v9, %v879_v21  ;;  %v395_v11 = vrot.slane %v327_v8, 1  ;;  %v396_v12 = vrot.slane %v327_v8, 2  ;;  %v397_v13 = vrot.slane %v327_v8, 3 }
 0x25d   :  { %v398_v14 = vrot.slane %v327_v8, 4  ;;  %v399_v28 = vrot.slane %v327_v8, 5  ;;  %v400_v35 = vrot.slane %v327_v8, 6  ;;  %v401_v37 = vrot.slane %v327_v8, 7 }
 0x25e   :  { %v410_v15 = vrot.slane %v393_v10, 1  ;;  %v411_v16 = vrot.slane %v393_v10, 2  ;;  %v412_v17 = vrot.slane %v393_v10, 3  ;;  %v413_v18 = vrot.slane %v393_v10, 4 }
 0x25f   :  { %v414_v19 = vrot.slane %v393_v10, 5  ;;  %v415_v20 = vrot.slane %v393_v10, 6  ;;  %v416_v22 = vrot.slane %v393_v10, 7  ;;  %v417_v23 = vperm.slane %v393_v10, 0 }
 0x260   :  { %v418_v24 = vperm.slane %v410_v15, 0  ;;  %v419_v25 = vperm.slane %v411_v16, 0  ;;  %v420_v26 = vperm.slane %v412_v17, 0  ;;  %v421_v27 = vperm.slane %v413_v18, 0 }
 0x261   :  { %v422_v29 = vperm.slane %v414_v19, 0  ;;  %v423_v21 = vperm.slane %v415_v20, 0  ;;  %v434_v30 = vsel %vm433_vm2, %v327_v8, %v417_v23  ;;  %v424_v31 = vperm.slane %v416_v22, 0 }
 0x262   :  { %v435_v32 = vsel %vm433_vm2, %v395_v11, %v418_v24  ;;  %v436_v33 = vsel %vm433_vm2, %v396_v12, %v419_v25  ;;  %v437_v34 = vsel %vm433_vm2, %v397_v13, %v420_v26  ;;  %442 = vst [vmem:[#allocation17] sm:$0x3] %v434_v30  ;;  %v438_v36 = vsel %vm433_vm2, %v398_v14, %v421_v27 }
 0x263   :  { %443 = vst [vmem:[#allocation17 + $0x2] sm:$0x3] %v435_v32  ;;  %v439_v38 = vsel %vm433_vm2, %v399_v28, %v422_v29  ;;  %v440_v39 = vsel %vm433_vm2, %v400_v35, %v423_v21  ;;  %v441_v40 = vsel %vm433_vm2, %v401_v37, %v424_v31 }
 0x264   :  { %444 = vst [vmem:[#allocation17 + $0x4] sm:$0x3] %v436_v33 }
 0x265   :  { %445 = vst [vmem:[#allocation17 + $0x6] sm:$0x3] %v437_v34 }
 0x266   :  { %446 = vst [vmem:[#allocation17 + $0x8] sm:$0x3] %v438_v36 }
 0x267   :  { %447 = vst [vmem:[#allocation17 + $0xa] sm:$0x3] %v439_v38 }
 0x268   :  { %448 = vst [vmem:[#allocation17 + $0xc] sm:$0x3] %v440_v39 }
 0x269   :  { %449 = vst [vmem:[#allocation17 + $0xe] sm:$0x3] %v441_v40 }
 0x26a   :  { %462 = dma.vmem_to_hbm [thread:$0]  %s455_s10, 256, %s457_s18, [#allocation4], %s762_s19, %s762_s19, %s763_s20  }
 0x26b   :  { %748 = dma.done.wait [#allocation4], 256  }
 0x26c   :  { %749 = vsyncadd [#allocation4], 4294967040 }
 0x26d   :  { %467 = vsyncpa [#allocation3], 1 }
 0x26e   :  { %468 = vsyncpa [#allocation6], 1 }
 0x26f   :  { %469 = vsyncpa [#allocation9], 1 }
 0x270   :  { %470 = vsyncpa [#allocation12], 1 }
 0x271   :  { %471 = vsyncpa [#allocation15], 1 }
 0x272   :  { %472 = vsyncpa [#allocation4], 1 }

</bundles_post_ra>
